<compile_context>
chip_gen: v6e
topology: v6e:2x2x1
jax: 0.10.0
libtpu: 0.0.40
codegen_flags: <defaults>
</compile_context>

<pallas_src>
import math

import jax
import jax.numpy as jnp
from jax.experimental import pallas as pl
from jax.experimental.pallas import tpu as pltpu

_LANE = 128
_BLOCK_BYTES = 2 << 20  # ~2 MiB per block; 8 MiB total pipeline VMEM.


def _identity_kernel(x_ref, o_ref):
    # Straight VMEM tile copy: load full block, store full block (unmasked,
    # lane-dense stores thanks to the wrapper-side lane-dense reshape).
    o_ref[...] = x_ref[...]


def scale_layer_forward(x, scale_alpha=None):
    """Identity forward of `scale_layer`.

    `scale_alpha` is a registered parameter of the PyTorch module but is not
    used in the forward pass, so it does not participate in the kernel.
    (The truly optimal lowering is `return x` with no kernel at all; the
    aliased copy below is kept only so a Pallas kernel is emitted.)
    """
    del scale_alpha  # unused in forward, kept for API fidelity with the nn.Module

    orig_shape = x.shape
    total = math.prod(orig_shape) if orig_shape else 1
    itemsize = jnp.dtype(x.dtype).itemsize
    # Minimum sublane multiple per dtype: f32 -> 8, bf16/f16 -> 16, int8/fp8 -> 32.
    sub = max(8, 32 // itemsize)

    # Pick the widest lane-dense last dim (multiple of 128) that divides total:
    # fewer, longer contiguous DMA descriptors on this mem-bound copy.
    cols = None
    for k in (64, 32, 16, 8, 4, 2, 1):
        c = _LANE * k
        if total % c == 0:
            cols = c
            break

    if cols is None:
        # Size not a multiple of 128: pad the flat array up to a dense
        # (rows, 128) slab with rows a multiple of the sublane count, copy,
        # then slice back.  Avoids a 1-of-8-sublane (1, N) layout.
        cols = _LANE
        padded_total = pl.cdiv(total, sub * _LANE) * (sub * _LANE)
        flat = jnp.pad(x.reshape(-1), (0, padded_total - total))
    else:
        padded_total = total
        flat = x.reshape(-1)

    rows = padded_total // cols
    row_bytes = cols * itemsize

    # Row tile: dtype-aware sublane multiple, capped at ~2 MiB per block.
    row_tile = min(rows, max(sub, (_BLOCK_BYTES // row_bytes) // sub * sub))
    grid_rows = pl.cdiv(rows, row_tile)  # ragged last block handled by Pallas

    x2 = flat.reshape(rows, cols)
    total_bytes = rows * cols * itemsize

    out2 = pl.pallas_call(
        _identity_kernel,
        out_shape=jax.ShapeDtypeStruct((rows, cols), x2.dtype),
        grid_spec=pltpu.PrefetchScalarGridSpec(
            num_scalar_prefetch=0,
            grid=(grid_rows,),
            in_specs=[pl.BlockSpec((row_tile, cols), lambda i: (i, 0))],
            out_specs=pl.BlockSpec((row_tile, cols), lambda i: (i, 0)),
        ),
        compiler_params=pltpu.CompilerParams(
            dimension_semantics=("parallel",),
            vmem_limit_bytes=32 << 20,
        ),
        cost_estimate=pl.CostEstimate(
            flops=0, transcendentals=0, bytes_accessed=2 * total_bytes),
        input_output_aliases={0: 0},
    )(x2)

    if padded_total != total:
        out2 = out2.reshape(-1)[:total]
    return out2.reshape(orig_shape)


if __name__ == "__main__":
    key = jax.random.PRNGKey(0)
    kx, ka = jax.random.split(key)

    # Small deterministic input; 3 channels and a (3, 3) alpha mirror the
    # PyTorch module's parameter shape (unused in forward).
    x = jax.random.normal(kx, (2, 3, 16, 16), dtype=jnp.float32)
    scale_alpha = jax.random.normal(ka, (3, 3), dtype=jnp.float32)  # unused in forward

    out = scale_layer_forward(x, scale_alpha)
    out = jax.block_until_ready(out)

    assert out.shape == x.shape
    assert out.dtype == x.dtype
    assert jnp.array_equal(out, x), "identity forward mismatch"

    print("KERNEL_OK")
</pallas_src>

<mosaic_0001>
module attributes {stable_mosaic.version = 11 : i64} {
  func.func @_identity_kernel(%arg0: i32, %arg1: memref<3x512xf32, #tpu.memory_space<vmem>>, %arg2: memref<3x512xf32, #tpu.memory_space<vmem>>) attributes {dimension_semantics = [#tpu.dimension_semantics<parallel>], iteration_bounds = array<i64: 1>, scalar_prefetch = 0 : i64, scratch_operands = 0 : i64, tpu.core_type = #tpu.core_type<tc>, window_params = [{transform_indices = @transform_0, window_bounds = array<i64: 3, 512>}, {transform_indices = @transform_1, window_bounds = array<i64: 3, 512>}]} {
    %c0 = arith.constant 0 : index
    %c0_0 = arith.constant 0 : index
    %0 = vector.load %arg1[%c0, %c0_0] : memref<3x512xf32, #tpu.memory_space<vmem>>, vector<3x512xf32>
    %c0_1 = arith.constant 0 : index
    %c0_2 = arith.constant 0 : index
    %1 = vector.load %arg2[%c0_1, %c0_2] : memref<3x512xf32, #tpu.memory_space<vmem>>, vector<3x512xf32>
    tpu.vector_store %arg2[%c0_1, %c0_2], %0 {strides = array<i32>} : memref<3x512xf32, #tpu.memory_space<vmem>>, vector<3x512xf32>,
    return
  }
  func.func @transform_0(%arg0: i32) -> (i32, i32) {
    %c0_i32 = arith.constant 0 : i32
    %c0_i32_0 = arith.constant 0 : i32
    return %arg0, %c0_i32 : i32, i32
  }
  func.func @transform_1(%arg0: i32) -> (i32, i32) {
    %c0_i32 = arith.constant 0 : i32
    %c0_i32_0 = arith.constant 0 : i32
    return %arg0, %c0_i32 : i32, i32
  }
}

</mosaic_0001>

<bundles_post_ra>
// kernel: tpu_custom_call.1
= control target key start
LH: loop header
LB: loop body
LE: loop exit
PB: predicated region body
PF: predicated region fallthrough
CT: control target
= control target key end

     0   :  { %6 = vsyncpa [#allocation3], 0  ;;  %s104_s0 = inlined_call_operand.hbm [shape: f32[3,512], index: 0, kind: input, shape index: {}, may-alias: {0,1}]   ;;  %s105_s1 = inlined_call_operand.hbm [shape: f32[3,512], index: 1, kind: output, shape index: {}, may-alias: {0,1}]  }
   0x1   :  { %7 = vsyncpa [#allocation4], 0  ;;  %s86_s6 = smov [#allocation2]  }
   0x2   :  { %s14_s7 = sshll.u32 %s86_s6, 4  ;;  %s15_s7 = int_to_ptr.vmem [resolvable:$true] %s14_s7 }
   0x3   :  { %s50_s8 = scalar_lea.vmem %s15_s7, 256  ;;  %p55_p1 = scmp.lt.s32.totalorder %s15_s7, %s15_s7 }
   0x4   :  { %p51_p0 = scmp.ne.s32.totalorder %s15_s7, %s50_s8  ;;  %p56_p2 = scmp.lt.s32.totalorder %s50_s8, %s50_s8 }
   0x6   :  { %p57_p3 = por %p56_p2, %p55_p1 }
   0x8   :  { %p58_p4 = pnand %p57_p3, %p51_p0 }
   0xa   :  { %61 = shalt.err (!%p58_p4)
}
   0xb   :  { %17 = dma.hbm_to_vmem [thread:$0]  %s104_s0, 256, %s15_s7, [#allocation3]  }
   0xc   :  { %82 = dma.done.wait [#allocation3], 256  }
   0xd   :  { %83 = vsyncadd [#allocation3], 4294967040  ;;  %s87_s11 = smov [#allocation5]   ;;  %v21_v0 = vld [vmem:[#allocation2] sm:$0x77] }
   0xe   :  { %s31_s12 = sshll.u32 %s87_s11, 4  ;;  %v22_v1 = vld [vmem:[#allocation2 + $0x8] sm:$0x77]  ;;  %23 = vst [vmem:[#allocation5] sm:$0x77] %v21_v0  ;;  %s32_s12 = int_to_ptr.vmem [resolvable:$true] %s31_s12 }
   0xf   :  { %24 = vst [vmem:[#allocation5 + $0x8] sm:$0x77] %v22_v1  ;;  %s62_s13 = scalar_lea.vmem %s32_s12, 256  ;;  %p67_p6 = scmp.lt.s32.totalorder %s32_s12, %s32_s12 }
  0x10   :  { %p63_p5 = scmp.ne.s32.totalorder %s32_s12, %s62_s13  ;;  %p68_p7 = scmp.lt.s32.totalorder %s62_s13, %s62_s13 }
  0x12   :  { %p69_p8 = por %p68_p7, %p67_p6 }
  0x14   :  { %p70_p9 = pnand %p69_p8, %p63_p5 }
  0x16   :  { %73 = shalt.err (!%p70_p9)
}
  0x17   :  { %34 = dma.vmem_to_hbm [thread:$0]  %s32_s12, 256, %s105_s1, [#allocation4]  }
  0x18   :  { %84 = dma.done.wait [#allocation4], 256  }
  0x19   :  { %85 = vsyncadd [#allocation4], 4294967040 }
  0x1a   :  { %38 = vsyncpa [#allocation3], 1 }
  0x1b   :  { %39 = vsyncpa [#allocation4], 1 }

</bundles_post_ra>
